<compile_context>
chip_gen: v7x
topology: tpu7x:2x2x1
jax: 0.10.0
libtpu: 0.0.40
codegen_flags: <defaults>
</compile_context>

<pallas_src>
import functools
import math

import jax
import jax.numpy as jnp
from jax import lax
from jax.experimental import pallas as pl
from jax.experimental.pallas import tpu as pltpu

_BIG = 3.0e38          # finite sentinel (robust vs +/-inf arithmetic)
_NORM_EPS_SQ = 1e-24   # (1e-12)^2 -> rsqrt(max(||x||^2, eps^2)) == 1/max(||x||, 1e-12)
_CLAMP_MIN = 1e-12     # sim.clamp(min=1e-12)


def _round_up(x, m):
    return (x + m - 1) // m * m


# ---------------------------------------------------------------------------
# Pass 1 (O(n*d), memory bound): L2-normalize rows once, write gram_dtype copy.
# ---------------------------------------------------------------------------
def _normalize_kernel(x_ref, xn_ref):
    x = x_ref[...].astype(jnp.float32)
    # F.normalize(x, dim=1): x * rsqrt(max(||x||^2, eps^2)) == x / max(||x||, eps)
    inv = lax.rsqrt(
        jnp.maximum(jnp.sum(x * x, axis=1, keepdims=True), _NORM_EPS_SQ))
    xn_ref[...] = (x * inv).astype(xn_ref.dtype)


def _normalize_rows(x_pad, gram_dtype, vmem_limit):
    n_pad, d_pad = x_pad.shape
    tb = math.gcd(n_pad, 256)   # divides n_pad; multiple of 8 since n_pad is
    return pl.pallas_call(
        _normalize_kernel,
        out_shape=jax.ShapeDtypeStruct((n_pad, d_pad), gram_dtype),
        grid_spec=pltpu.PrefetchScalarGridSpec(
            num_scalar_prefetch=0,
            grid=(n_pad // tb,),
            in_specs=[pl.BlockSpec((tb, d_pad), lambda i: (i, 0))],
            out_specs=pl.BlockSpec((tb, d_pad), lambda i: (i, 0)),
        ),
        compiler_params=pltpu.CompilerParams(
            dimension_semantics=(pltpu.PARALLEL,),
            vmem_limit_bytes=vmem_limit),
    )(x_pad)


# ---------------------------------------------------------------------------
# Pass 2 (O(n^2*d), MXU bound): flash-style online hard mining.  The (n, n)
# similarity matrix is never materialized; running hardest-positive (row min
# over same class) / hardest-negative (row max over different class) live in
# (tm, 1) f32 VMEM scratch, initialized at column step 0 and turned into the
# per-row hinge at the last column step.
# ---------------------------------------------------------------------------
def _triplet_sscl_kernel(xn_row_ref, xn_colT_ref, t_col_ref, t_row_ref,
                         hinge_ref, ap_ref, an_ref, *, margin):
    j = pl.program_id(1)

    @pl.when(j == 0)
    def _init():
        ap_ref[...] = jnp.full_like(ap_ref, _BIG)     # running min over positives
        an_ref[...] = jnp.full_like(an_ref, -_BIG)    # running max over negatives

    # Gram tile on the MXU: pre-normalized gram_dtype operands, NN layout
    # (row tile (tm, d) @ pre-transposed column tile (d, tn)), f32 accumulate.
    sim = jnp.dot(xn_row_ref[...], xn_colT_ref[...],
                  preferred_element_type=jnp.float32)          # (tm, tn) f32
    sim = jnp.maximum(sim, _CLAMP_MIN)                         # sim.clamp(min=1e-12)

    # Same-class mask via broadcast compare of pre-laid-out target tiles
    # (no in-kernel transpose competing with the row reductions for the XLU).
    mask = t_col_ref[...] == t_row_ref[...]                    # (tm,1)==(1,tn)

    # Online hard mining (sim and mask computed once, reused for both selects).
    ap_ref[...] = jnp.minimum(
        ap_ref[...],
        jnp.min(jnp.where(mask, sim, _BIG), axis=1, keepdims=True))
    an_ref[...] = jnp.maximum(
        an_ref[...],
        jnp.max(jnp.where(mask, -_BIG, sim), axis=1, keepdims=True))

    # MarginRankingLoss(margin) with y = 1: per-row max(0, sim_an - sim_ap + margin)
    @pl.when(j == pl.num_programs(1) - 1)
    def _finalize():
        hinge_ref[...] = jnp.maximum(an_ref[...] - ap_ref[...] + margin, 0.0)


def triplet_loss_sscl(inputs, targets, margin=0.3, *,
                      block_m=1024, block_n=512, gram_dtype=jnp.bfloat16,
                      core_parallel=False):
    """inputs: (n, feat_dim) float; targets: (n,) int. Returns scalar f32 loss.

    Set core_parallel=True on v7x (2 TensorCores/chip) to shard row tiles
    across cores; leave False on single-core v5e/v6e.
    gram_dtype=jnp.float32 gives the bit-faithful (slower) Gram path.
    """
    n, d = inputs.shape

    # --- tile sizes; row/column paddings are decoupled so padding <= 1 tile --
    tm = _round_up(min(block_m, _round_up(n, 8)), 8)            # sublane-aligned
    tn = _round_up(min(block_n, _round_up(n, 128)), 128)        # lane-aligned
    n_pad_m = _round_up(n, tm)        # row padding
    n_pad_n = _round_up(n, tn)        # column padding
    n_pad = max(n_pad_m, n_pad_n)     # normalize once at the larger padding
    d_pad = _round_up(d, 128)

    # Zero padding is inert:
    #  * zero feature columns change no norms or dot products;
    #  * zero-padded rows normalize to 0, so sim(real_i, pad_j) clamps to
    #    exactly 1e-12 <= every real clamped similarity -> never the hardest
    #    negative, and their label (pad_label) matches no real class -> never
    #    a positive.  Padded rows themselves are sliced off before the mean.
    x_pad = jnp.pad(inputs, ((0, n_pad - n), (0, d_pad - d)))

    t = targets.astype(jnp.int32)
    i32 = jnp.iinfo(jnp.int32)
    # Guard the wrap if a target equals INT32_MIN (pathological but cheap).
    pad_label = jnp.where(jnp.min(t) == i32.min, jnp.max(t) + 1, jnp.min(t) - 1)
    t_pad = jnp.concatenate([t, jnp.full((n_pad - n,), pad_label, jnp.int32)])
    t_col = t_pad[:n_pad_m].reshape(n_pad_m, 1)
    t_row = t_pad[:n_pad_n].reshape(1, n_pad_n)

    # VMEM budget: double-buffered row + column tiles plus slack, capped at
    # v7x's 64 MiB physical VMEM (v5e/v6e have 128 MiB so this is also safe).
    gram_bytes = jnp.dtype(gram_dtype).itemsize
    vmem_limit = min(64 * 1024 * 1024,
                     max(32 * 1024 * 1024,
                         int(2.5 * (tm + tn) * d_pad * gram_bytes) + (4 << 20)))

    # Pass 1: normalized gram_dtype copy (written once to HBM, reused below).
    xn_full = _normalize_rows(x_pad, gram_dtype, vmem_limit)
    xn_rows = xn_full[:n_pad_m]            # (n_pad_m, d_pad)  row stream
    xn_cols_t = xn_full[:n_pad_n].T        # (d_pad, n_pad_n)  lane-dense column
                                           # stream: one-time O(n*d) transpose so
                                           # the hot loop is a plain NN matmul.

    grid = (n_pad_m // tm, n_pad_n // tn)
    kernel = functools.partial(_triplet_sscl_kernel, margin=float(margin))
    row_sem = pltpu.CORE_PARALLEL if core_parallel else pltpu.PARALLEL

    hinge = pl.pallas_call(
        kernel,
        out_shape=jax.ShapeDtypeStruct((n_pad_m, 1), jnp.float32),
        grid_spec=pltpu.PrefetchScalarGridSpec(
            num_scalar_prefetch=0,
            grid=grid,
            in_specs=[
                pl.BlockSpec((tm, d_pad), lambda i, j: (i, 0)),   # xn row tile
                pl.BlockSpec((d_pad, tn), lambda i, j: (0, j)),   # xn^T col tile
                pl.BlockSpec((tm, 1), lambda i, j: (i, 0)),       # targets (rows)
                pl.BlockSpec((1, tn), lambda i, j: (0, j)),       # targets (cols)
            ],
            out_specs=pl.BlockSpec((tm, 1), lambda i, j: (i, 0)),  # per-row hinge
            scratch_shapes=[pltpu.VMEM((tm, 1), jnp.float32),      # running sim_ap
                            pltpu.VMEM((tm, 1), jnp.float32)],     # running sim_an
        ),
        compiler_params=pltpu.CompilerParams(
            dimension_semantics=(row_sem, pltpu.ARBITRARY),
            vmem_limit_bytes=vmem_limit),
    )(xn_rows, xn_cols_t, t_col, t_row)

    # Tiny final reduction (mean over the n real rows) in plain JAX.
    return jnp.sum(hinge[:n, 0]) / n


def _reference(inputs, targets, margin=0.3):
    x = inputs.astype(jnp.float32)
    xn = x / jnp.maximum(jnp.sqrt(jnp.sum(x * x, axis=1, keepdims=True)), 1e-12)
    sim = jnp.maximum(xn @ xn.T, 1e-12)
    mask = targets[:, None] == targets[None, :]
    sim_ap = jnp.min(jnp.where(mask, sim, jnp.inf), axis=1)
    sim_an = jnp.max(jnp.where(mask, -jnp.inf, sim), axis=1)
    return jnp.mean(jnp.maximum(sim_an - sim_ap + margin, 0.0))


if __name__ == "__main__":
    key = jax.random.PRNGKey(0)

    # --- small, deliberately non-tile-aligned case (exercises padding) -------
    n, feat_dim = 16, 48
    inputs = jax.random.normal(key, (n, feat_dim), dtype=jnp.float32)
    targets = jnp.array([0, 0, 0, 1, 1, 1, 2, 2, 2, 0, 1, 2, 0, 1, 2, 2],
                        dtype=jnp.int32)
    ref = _reference(inputs, targets, margin=0.3)

    # Bit-faithful f32 Gram path.
    loss_f32 = triplet_loss_sscl(inputs, targets, margin=0.3,
                                 gram_dtype=jnp.float32)
    jax.block_until_ready(loss_f32)
    assert jnp.allclose(loss_f32, ref, atol=1e-2, rtol=1e-2), (loss_f32, ref)

    # Default fast path (bf16 pre-normalized stream, f32 accumulation) —
    # looser tolerance since near-tie hard examples may be mined slightly
    # differently in bf16 (documented/accepted trade-off).
    loss_bf16 = triplet_loss_sscl(inputs, targets, margin=0.3)
    jax.block_until_ready(loss_bf16)
    assert jnp.allclose(loss_bf16, ref, atol=3e-2, rtol=3e-2), (loss_bf16, ref)

    # --- multi-tile case: several row tiles and >1 column step (exercises the
    #     online min/max accumulation across the reduction axis) --------------
    k1, k2 = jax.random.split(key)
    n2, d2 = 200, 40
    inputs2 = jax.random.normal(k1, (n2, d2), dtype=jnp.float32)
    targets2 = jax.random.randint(k2, (n2,), 0, 5, dtype=jnp.int32)
    ref2 = _reference(inputs2, targets2, margin=0.3)
    loss2 = triplet_loss_sscl(inputs2, targets2, margin=0.3,
                              block_m=64, block_n=128, gram_dtype=jnp.float32)
    jax.block_until_ready(loss2)
    assert jnp.allclose(loss2, ref2, atol=1e-2, rtol=1e-2), (loss2, ref2)

    print("KERNEL_OK")
</pallas_src>

<mosaic_0001>
module attributes {stable_mosaic.version = 11 : i64} {
  func.func @_normalize_kernel(%arg0: i32, %arg1: memref<128x128xf32, #tpu.memory_space<vmem>>, %arg2: memref<128x128xf32, #tpu.memory_space<vmem>>) attributes {dimension_semantics = [#tpu.dimension_semantics<parallel>], iteration_bounds = array<i64: 1>, scalar_prefetch = 0 : i64, scratch_operands = 0 : i64, tpu.core_type = #tpu.core_type<tc>, window_params = [{transform_indices = @transform_0, window_bounds = array<i64: 128, 128>}, {transform_indices = @transform_1, window_bounds = array<i64: 128, 128>}]} {
    %c0 = arith.constant 0 : index
    %c0_0 = arith.constant 0 : index
    %0 = vector.load %arg1[%c0, %c0_0] : memref<128x128xf32, #tpu.memory_space<vmem>>, vector<128x128xf32>
    %1 = arith.mulf %0, %0 : vector<128x128xf32>
    %cst = arith.constant dense<0.000000e+00> : vector<128xf32>
    %2 = vector.multi_reduction <add>, %1, %cst [1] : vector<128x128xf32> to vector<128xf32>
    %3 = vector.shape_cast %2 : vector<128xf32> to vector<128x1xf32>
    %cst_1 = arith.constant 1.000000e-24 : f32
    %4 = vector.broadcast %cst_1 : f32 to vector<128x1xf32>
    %5 = arith.maximumf %3, %4 : vector<128x1xf32>
    %6 = math.rsqrt %5 : vector<128x1xf32>
    %7 = vector.broadcast %6 : vector<128x1xf32> to vector<128x128xf32>
    %8 = arith.mulf %0, %7 : vector<128x128xf32>
    %c0_2 = arith.constant 0 : index
    %c0_3 = arith.constant 0 : index
    %9 = vector.load %arg2[%c0_2, %c0_3] : memref<128x128xf32, #tpu.memory_space<vmem>>, vector<128x128xf32>
    tpu.vector_store %arg2[%c0_2, %c0_3], %8 {strides = array<i32>} : memref<128x128xf32, #tpu.memory_space<vmem>>, vector<128x128xf32>,
    return
  }
  func.func @transform_0(%arg0: i32) -> (i32, i32) {
    %c0_i32 = arith.constant 0 : i32
    %c0_i32_0 = arith.constant 0 : i32
    return %arg0, %c0_i32 : i32, i32
  }
  func.func @transform_1(%arg0: i32) -> (i32, i32) {
    %c0_i32 = arith.constant 0 : i32
    %c0_i32_0 = arith.constant 0 : i32
    return %arg0, %c0_i32 : i32, i32
  }
}

</mosaic_0001>

<bundles_post_ra>
// kernel: tpu_custom_call.1
= control target key start
LH: loop header
LB: loop body
LE: loop exit
PB: predicated region body
PF: predicated region fallthrough
CT: control target
= control target key end

     0   :  { %6 = vsyncpa [#allocation3], 0  ;;  %s376_s0 = inlined_call_operand.hbm [shape: f32[128,128], index: 0, kind: input, shape index: {}]   ;;  %s377_s1 = inlined_call_operand.hbm [shape: f32[128,128], index: 1, kind: output, shape index: {}]  }
   0x1   :  { %7 = vsyncpa [#allocation4], 0  ;;  %s252_s6 = smov [#allocation2]   ;;  %s204_s10 = scalar_lea.hbm %s376_s0, 2048 }
   0x2   :  { %s13_s7 = sshll.u32 %s252_s6, 4  ;;  %p205_p0 = scmp.ne.s32.totalorder %s376_s0, %s204_s10  ;;  %s14_s7 = int_to_ptr.vmem [resolvable:$true] %s13_s7 }
   0x3   :  { %p208_p1 = scmp.lt.u32.totalorder %s204_s10, %s376_s0 }
   0x5   :  { %p210_p2 = pnand %p208_p1, %p205_p0 }
   0x7   :  { %213 = shalt.err (!%p210_p2)
}
   0x8   :  { %s214_s15 = scalar_lea.vmem %s14_s7, 2048  ;;  %p219_p4 = scmp.lt.s32.totalorder %s14_s7, %s14_s7 }
   0x9   :  { %p215_p3 = scmp.ne.s32.totalorder %s14_s7, %s214_s15  ;;  %p220_p5 = scmp.lt.s32.totalorder %s214_s15, %s214_s15 }
   0xb   :  { %p221_p6 = por %p220_p5, %p219_p4 }
   0xd   :  { %p222_p7 = pnand %p221_p6, %p215_p3 }
   0xf   :  { %225 = shalt.err (!%p222_p7)
}
  0x10   :  { %s253_s16 = smov 128   ;;  %s254_s17 = smov 8  }
  0x11   :  { %19 = dma.hbm_to_vmem [thread:$0]  %s376_s0, 2048, %s14_s7, [#allocation3], %s253_s16, %s253_s16, %s254_s17  }
  0x12   :  { %248 = dma.done.wait [#allocation3], 2048  }
  0x13   :  { %249 = vsyncadd [#allocation3], 4294965248  ;;  %v281_v0 = vld [vmem:[#allocation2 + $0x10] sm:$0xff]  ;;  %v283_v1 = vld [vmem:[#allocation2] sm:$0xff]  ;;  %s255_s0 = smov [#allocation5]  }
  0x14   :  { %v285_v2 = vld [vmem:[#allocation2 + $0x18] sm:$0xff]  ;;  %v41_v3 = vmul.f32 %v281_v0, %v281_v0  ;;  %v39_v4 = vmul.f32 %v283_v1, %v283_v1  ;;  %v291_v5 = vld [vmem:[#allocation2 + $0x8] sm:$0xff]  ;;  %v299_v9 = vld [vmem:[#allocation2 + $0x20] sm:$0xff]  ;;  %s156_s20 = sshll.u32 %s255_s0, 4  ;;  %s157_s20 = int_to_ptr.vmem [resolvable:$true] %s156_s20 }
  0x15   :  { %v42_v6 = vmul.f32 %v285_v2, %v285_v2  ;;  %v40_v7 = vmul.f32 %v291_v5, %v291_v5  ;;  %v297_v8 = vld [vmem:[#allocation2 + $0x28] sm:$0xff]  ;;  %v43_v11 = vmul.f32 %v299_v9, %v299_v9  ;;  %v305_v12 = vld [vmem:[#allocation2 + $0x38] sm:$0xff]  ;;  %v307_v13 = vld [vmem:[#allocation2 + $0x30] sm:$0xff]  ;;  %s226_s21 = scalar_lea.vmem %s157_s20, 2048  ;;  %p231_p9 = scmp.lt.s32.totalorder %s157_s20, %s157_s20 }
  0x16   :  { %59 = vadd.xlane.f32.xlu1 %v41_v3  ;;  %55 = vadd.xlane.f32.xlu0 %v39_v4  ;;  %v44_v10 = vmul.f32 %v297_v8, %v297_v8  ;;  %v46_v14 = vmul.f32 %v305_v12, %v305_v12  ;;  %v45_v15 = vmul.f32 %v307_v13, %v307_v13  ;;  %v313_v16 = vld [vmem:[#allocation2 + $0x48] sm:$0xff]  ;;  %v315_v17 = vld [vmem:[#allocation2 + $0x40] sm:$0xff]  ;;  %v321_v20 = vld [vmem:[#allocation2 + $0x58] sm:$0xff]  ;;  %p227_p8 = scmp.ne.s32.totalorder %s157_s20, %s226_s21  ;;  %p232_p10 = scmp.lt.s32.totalorder %s226_s21, %s226_s21 }
  0x17   :  { %v48_v18 = vmul.f32 %v313_v16, %v313_v16  ;;  %v47_v19 = vmul.f32 %v315_v17, %v315_v17  ;;  %v323_v21 = vld [vmem:[#allocation2 + $0x50] sm:$0xff]  ;;  %v50_v22 = vmul.f32 %v321_v20, %v321_v20  ;;  %v329_v24 = vld [vmem:[#allocation2 + $0x68] sm:$0xff]  ;;  %v331_v25 = vld [vmem:[#allocation2 + $0x60] sm:$0xff] }
  0x18   :  { %v49_v23 = vmul.f32 %v323_v21, %v323_v21  ;;  %v52_v26 = vmul.f32 %v329_v24, %v329_v24  ;;  %v51_v27 = vmul.f32 %v331_v25, %v331_v25  ;;  %v337_v28 = vld [vmem:[#allocation2 + $0x78] sm:$0xff]  ;;  %v339_v29 = vld [vmem:[#allocation2 + $0x70] sm:$0xff]  ;;  %p233_p11 = por %p232_p10, %p231_p9 }
  0x19   :  { %v54_v30 = vmul.f32 %v337_v28, %v337_v28  ;;  %v53_v31 = vmul.f32 %v339_v29, %v339_v29 }
  0x1a   :  { %61 = vadd.xlane.f32.xlu1 %v42_v6  ;;  %57 = vadd.xlane.f32.xlu0 %v40_v7  ;;  %p234_p12 = pnand %p233_p11, %p227_p8 }
  0x1e   :  { %65 = vadd.xlane.f32.xlu1 %v44_v10  ;;  %63 = vadd.xlane.f32.xlu0 %v43_v11 }
  0x22   :  { %69 = vadd.xlane.f32.xlu1 %v46_v14  ;;  %67 = vadd.xlane.f32.xlu0 %v45_v15 }
  0x26   :  { %73 = vadd.xlane.f32.xlu1 %v48_v18  ;;  %71 = vadd.xlane.f32.xlu0 %v47_v19 }
  0x2a   :  { %77 = vadd.xlane.f32.xlu1 %v50_v22  ;;  %75 = vadd.xlane.f32.xlu0 %v49_v23 }
  0x2e   :  { %81 = vadd.xlane.f32.xlu1 %v52_v26  ;;  %79 = vadd.xlane.f32.xlu0 %v51_v27 }
  0x32   :  { %85 = vadd.xlane.f32.xlu1 %v54_v30  ;;  %83 = vadd.xlane.f32.xlu0 %v53_v31 }
  0xa3   :  { %v60_v32 = vpop.xlane.xlu1 %59  ;;  %v56_v33 = vpop.xlane.xlu0 %55 }
  0xa4   :  { %v89_v34 = vmax.f32 %v60_v32, 1e-24  ;;  %v87_v35 = vmax.f32 %v56_v33, 1e-24 }
  0xa6   :  { %172 = vrsqrt.f32 %v89_v34 }
  0xa7   :  { %174 = vrsqrt.f32 %v87_v35  ;;  %v62_v36 = vpop.xlane.xlu1 %61  ;;  %v58_v37 = vpop.xlane.xlu0 %57 }
  0xa8   :  { %v90_v38 = vmax.f32 %v62_v36, 1e-24  ;;  %v88_v39 = vmax.f32 %v58_v37, 1e-24 }
  0xaa   :  { %176 = vrsqrt.f32 %v90_v38 }
  0xab   :  { %178 = vrsqrt.f32 %v88_v39  ;;  %v66_v40 = vpop.xlane.xlu1 %65  ;;  %v64_v41 = vpop.xlane.xlu0 %63 }
  0xac   :  { %v92_v42 = vmax.f32 %v66_v40, 1e-24  ;;  %v91_v43 = vmax.f32 %v64_v41, 1e-24 }
  0xae   :  { %180 = vrsqrt.f32 %v92_v42 }
  0xaf   :  { %182 = vrsqrt.f32 %v91_v43  ;;  %v70_v44 = vpop.xlane.xlu1 %69  ;;  %v68_v45 = vpop.xlane.xlu0 %67 }
  0xb0   :  { %v173_v46 = vpop.eup %172  ;;  %v94_v47 = vmax.f32 %v70_v44, 1e-24  ;;  %v93_v48 = vmax.f32 %v68_v45, 1e-24 }
  0xb1   :  { %v175_v49 = vpop.eup %174  ;;  %v121_v50 = vmul.f32 %v173_v46, %v281_v0 }
  0xb2   :  { %v119_v51 = vmul.f32 %v175_v49, %v283_v1  ;;  %184 = vrsqrt.f32 %v94_v47 }
  0xb3   :  { %137 = vst [vmem:[#allocation5 + $0x10] sm:$0xff] %v121_v50  ;;  %186 = vrsqrt.f32 %v93_v48  ;;  %v74_v52 = vpop.xlane.xlu1 %73  ;;  %v72_v53 = vpop.xlane.xlu0 %71 }
  0xb4   :  { %v177_v54 = vpop.eup %176  ;;  %135 = vst [vmem:[#allocation5] sm:$0xff] %v119_v51  ;;  %v96_v55 = vmax.f32 %v74_v52, 1e-24  ;;  %v95_v56 = vmax.f32 %v72_v53, 1e-24 }
  0xb5   :  { %v179_v57 = vpop.eup %178  ;;  %v122_v58 = vmul.f32 %v177_v54, %v285_v2 }
  0xb6   :  { %v120_v59 = vmul.f32 %v179_v57, %v291_v5  ;;  %188 = vrsqrt.f32 %v96_v55 }
  0xb7   :  { %138 = vst [vmem:[#allocation5 + $0x18] sm:$0xff] %v122_v58  ;;  %190 = vrsqrt.f32 %v95_v56  ;;  %v78_v60 = vpop.xlane.xlu1 %77  ;;  %v76_v61 = vpop.xlane.xlu0 %75 }
  0xb8   :  { %v181_v62 = vpop.eup %180  ;;  %136 = vst [vmem:[#allocation5 + $0x8] sm:$0xff] %v120_v59  ;;  %v98_v63 = vmax.f32 %v78_v60, 1e-24  ;;  %v97_v0 = vmax.f32 %v76_v61, 1e-24 }
  0xb9   :  { %v183_v1 = vpop.eup %182  ;;  %v124_v3 = vmul.f32 %v181_v62, %v297_v8 }
  0xba   :  { %v123_v4 = vmul.f32 %v183_v1, %v299_v9  ;;  %192 = vrsqrt.f32 %v98_v63 }
  0xbb   :  { %140 = vst [vmem:[#allocation5 + $0x28] sm:$0xff] %v124_v3  ;;  %194 = vrsqrt.f32 %v97_v0  ;;  %v82_v2 = vpop.xlane.xlu1 %81  ;;  %v80_v6 = vpop.xlane.xlu0 %79 }
  0xbc   :  { %v185_v5 = vpop.eup %184  ;;  %139 = vst [vmem:[#allocation5 + $0x20] sm:$0xff] %v123_v4  ;;  %v100_v7 = vmax.f32 %v82_v2, 1e-24  ;;  %v99_v10 = vmax.f32 %v80_v6, 1e-24 }
  0xbd   :  { %v187_v11 = vpop.eup %186  ;;  %v126_v14 = vmul.f32 %v185_v5, %v305_v12 }
  0xbe   :  { %v125_v15 = vmul.f32 %v187_v11, %v307_v13  ;;  %196 = vrsqrt.f32 %v100_v7 }
  0xbf   :  { %142 = vst [vmem:[#allocation5 + $0x38] sm:$0xff] %v126_v14  ;;  %198 = vrsqrt.f32 %v99_v10  ;;  %v86_v8 = vpop.xlane.xlu1 %85  ;;  %v84_v18 = vpop.xlane.xlu0 %83 }
  0xc0   :  { %v189_v9 = vpop.eup %188  ;;  %141 = vst [vmem:[#allocation5 + $0x30] sm:$0xff] %v125_v15  ;;  %v102_v19 = vmax.f32 %v86_v8, 1e-24  ;;  %v101_v22 = vmax.f32 %v84_v18, 1e-24 }
  0xc1   :  { %v191_v23 = vpop.eup %190  ;;  %v128_v26 = vmul.f32 %v189_v9, %v313_v16 }
  0xc2   :  { %v127_v27 = vmul.f32 %v191_v23, %v315_v17  ;;  %200 = vrsqrt.f32 %v102_v19 }
  0xc3   :  { %144 = vst [vmem:[#allocation5 + $0x48] sm:$0xff] %v128_v26  ;;  %202 = vrsqrt.f32 %v101_v22 }
  0xc4   :  { %v193_v12 = vpop.eup %192  ;;  %143 = vst [vmem:[#allocation5 + $0x40] sm:$0xff] %v127_v27 }
  0xc5   :  { %v195_v13 = vpop.eup %194  ;;  %v130_v30 = vmul.f32 %v193_v12, %v321_v20 }
  0xc6   :  { %v129_v31 = vmul.f32 %v195_v13, %v323_v21 }
  0xc7   :  { %146 = vst [vmem:[#allocation5 + $0x58] sm:$0xff] %v130_v30 }
  0xc8   :  { %v197_v32 = vpop.eup %196  ;;  %145 = vst [vmem:[#allocation5 + $0x50] sm:$0xff] %v129_v31 }
  0xc9   :  { %v199_v33 = vpop.eup %198  ;;  %v132_v34 = vmul.f32 %v197_v32, %v329_v24 }
  0xca   :  { %v131_v16 = vmul.f32 %v199_v33, %v331_v25 }
  0xcb   :  { %148 = vst [vmem:[#allocation5 + $0x68] sm:$0xff] %v132_v34 }
  0xcc   :  { %v201_v17 = vpop.eup %200  ;;  %147 = vst [vmem:[#allocation5 + $0x60] sm:$0xff] %v131_v16 }
  0xcd   :  { %v203_v35 = vpop.eup %202  ;;  %v134_v36 = vmul.f32 %v201_v17, %v337_v28 }
  0xce   :  { %v133_v20 = vmul.f32 %v203_v35, %v339_v29 }
  0xcf   :  { %150 = vst [vmem:[#allocation5 + $0x78] sm:$0xff] %v134_v36 }
  0xd0   :  { %149 = vst [vmem:[#allocation5 + $0x70] sm:$0xff] %v133_v20 }
  0xd1   :  { %237 = shalt.err (!%p234_p12)
}
  0xd2   :  { %s238_s24 = scalar_lea.hbm %s377_s1, 2048 }
  0xd3   :  { %p239_p13 = scmp.ne.s32.totalorder %s377_s1, %s238_s24  ;;  %p242_p0 = scmp.lt.u32.totalorder %s238_s24, %s377_s1 }
  0xd5   :  { %p244_p1 = pnand %p242_p0, %p239_p13 }
  0xd7   :  { %247 = shalt.err (!%p244_p1)
}
  0xd8   :  { %162 = dma.vmem_to_hbm [thread:$0]  %s157_s20, 2048, %s377_s1, [#allocation4], %s253_s16, %s253_s16, %s254_s17  }
  0xd9   :  { %250 = dma.done.wait [#allocation4], 2048  }
  0xda   :  { %251 = vsyncadd [#allocation4], 4294965248 }
  0xdb   :  { %166 = vsyncpa [#allocation3], 1 }
  0xdc   :  { %167 = vsyncpa [#allocation4], 1 }

</bundles_post_ra>
